<compile_context>
chip_gen: v7x
topology: tpu7x:2x2x1
jax: 0.10.0
libtpu: 0.0.40
codegen_flags: <defaults>
</compile_context>

<pallas_src>
import functools

import jax
import jax.numpy as jnp
from jax import lax
from jax.experimental import pallas as pl
from jax.experimental.pallas import tpu as pltpu


def _ls_ce_kernel(x_ref, t_ref, out_ref,
                  m_acc, l_acc, sx_acc, xt_acc, *,
                  n_words, n_rows, block_rows, block_cols, mask_cols):
    """Grid = (row_blocks ["parallel"], vocab_blocks ["arbitrary"])."""
    i = pl.program_id(0)          # row-block index
    v = pl.program_id(1)          # vocab-block index (innermost, sequential)
    num_v = pl.num_programs(1)
    br, tv = block_rows, block_cols

    def gcol():
        # Recomputed per use (cheap VPU iota) -> no full-tile int32 live range.
        return v * tv + lax.broadcasted_iota(jnp.int32, (br, tv), 1)

    def x32():
        # Fresh single-use ref read: the f32 upcast fuses into each reduction,
        # no materialized full-tile f32 temporary.
        return x_ref[...].astype(jnp.float32)

    # ---- init per-row online-softmax accumulators on the first vocab block.
    @pl.when(v == 0)
    def _():
        m_acc[...] = jnp.full_like(m_acc, -1e30)
        l_acc[...] = jnp.zeros_like(l_acc)
        sx_acc[...] = jnp.zeros_like(sx_acc)
        xt_acc[...] = jnp.zeros_like(xt_acc)

    # ---- running max (bf16 max is exact -> reduce in the native dtype when
    #      no column masking is needed; Mosaic masks physical lane padding).
    if mask_cols:
        m_blk = jnp.max(jnp.where(gcol() < n_words, x32(), -1e30),
                        axis=-1, keepdims=True)
    else:
        m_blk = jnp.max(x_ref[...], axis=-1, keepdims=True).astype(jnp.float32)
    m_prev = m_acc[...]
    m_new = jnp.maximum(m_prev, m_blk)

    # ---- rescaled running sum(exp(x - m)).
    if mask_cols:
        p_sum = jnp.sum(
            jnp.where(gcol() < n_words, jnp.exp(x32() - m_new), 0.0),
            axis=-1, keepdims=True)
    else:
        p_sum = jnp.sum(jnp.exp(x32() - m_new), axis=-1, keepdims=True)
    l_acc[...] = l_acc[...] * jnp.exp(m_prev - m_new) + p_sum
    m_acc[...] = m_new

    # ---- running sum of raw logits (for the smoothing term).
    if mask_cols:
        sx_blk = jnp.sum(jnp.where(gcol() < n_words, x32(), 0.0),
                         axis=-1, keepdims=True)
    else:
        sx_blk = jnp.sum(x32(), axis=-1, keepdims=True)
    sx_acc[...] = sx_acc[...] + sx_blk

    # ---- running x[row, target[row]] via one-hot select-sum.  The target
    #      column is always < n_words, so garbage columns can never match.
    xt_acc[...] = xt_acc[...] + jnp.sum(
        jnp.where(gcol() == t_ref[...], x32(), 0.0), axis=-1, keepdims=True)

    # ---- finalize: per-row losses -> lane-dense partial sums.
    @pl.when(v == num_v - 1)
    def _():
        lse = m_acc[...] + jnp.log(l_acc[...])                 # (br, 1)
        nll = lse - xt_acc[...]
        smooth = jnp.float32(n_words) * lse - sx_acc[...]

        # Mask rows past the (unpadded) row extent; select-before-sum also
        # squashes any NaN/Inf coming from garbage in partial edge blocks.
        row = lax.broadcasted_iota(jnp.int32, (br, 1), 0)
        row_valid = (i * br + row) < n_rows
        nll = jnp.where(row_valid, nll, 0.0)
        smooth = jnp.where(row_valid, smooth, 0.0)

        nll_sum = jnp.sum(nll)
        smooth_sum = jnp.sum(smooth)

        r = lax.broadcasted_iota(jnp.int32, (1, 8, 128), 1)
        c = lax.broadcasted_iota(jnp.int32, (1, 8, 128), 2)
        vals = jnp.where(c == 0, nll_sum, jnp.where(c == 1, smooth_sum, 0.0))
        out_ref[...] = jnp.where(r == 0, vals, 0.0)


def _vmem_capacity_bytes():
    try:
        info = pltpu.get_tpu_info()
        cap = getattr(info, "vmem_capacity_bytes", None)
        if cap:
            return int(cap)
    except Exception:
        pass
    return 64 * 1024 * 1024          # conservative (v7x-sized) fallback


def label_smoothing_cross_entropy(x, target, *, smoothing=0.0,
                                  block_rows=None, block_cols=None):
    """Pallas TPU implementation of LabelSmoothingCrossEntropy.forward.

    x:      (N, V) float logits (f32 or bf16)
    target: (N,)   int class indices
    returns scalar float32 loss
    """
    n_rows, n_words = x.shape
    itemsize = jnp.dtype(x.dtype).itemsize

    # ---- generation-aware VMEM budget -------------------------------------
    vmem_cap = _vmem_capacity_bytes()
    vmem_limit = int(min(max(vmem_cap // 2, 16 * 1024 * 1024),
                         64 * 1024 * 1024))   # 64 MiB v5e/v6e, 32 MiB v7x
    # per element: double-buffered input (its own dtype) + ~2 f32 working
    # passes of headroom; 4 MiB reserve for target/scratch/output/internal.
    bytes_per_elem = 2 * itemsize + 8
    usable = max(vmem_limit - 4 * 1024 * 1024, 2 * 1024 * 1024)
    max_elems = max(usable // bytes_per_elem, 8 * 128)

    rows8 = 8 * pl.cdiv(n_rows, 8)

    # ---- choose the (block_rows x block_cols) tile -------------------------
    if block_cols is None:
        if block_rows is not None:
            full_ok = (max_elems // max(int(block_rows), 8)) >= n_words
        else:
            br_fullv = min((max_elems // n_words) // 8 * 8, 2048, rows8)
            full_ok = br_fullv >= min(rows8, 128)
        if full_ok:
            tv = n_words                       # single full-vocab block
        else:
            rt = int(block_rows) if block_rows is not None else min(rows8, 256)
            tv = (max_elems // max(rt, 8)) // 128 * 128
            tv = int(min(max(tv, 128), 128 * pl.cdiv(n_words, 128)))
    else:
        tv = int(block_cols)
    if tv >= n_words:
        tv = n_words                           # block dim == full array dim
    assert tv == n_words or tv % 128 == 0

    if block_rows is None:
        br = (max_elems // max(tv, 1)) // 8 * 8
        br = int(min(max(br, 8), 2048, rows8))
    else:
        br = int(block_rows)
        assert br % 8 == 0 and br >= 8
    # keep the row block inside the (unpadded) row extent
    if n_rows < 8:
        br = n_rows                            # block dim == full array dim
    else:
        br = max(8, min(br, (n_rows // 8) * 8))

    num_row_blocks = pl.cdiv(n_rows, br)
    num_v_blocks = pl.cdiv(n_words, tv)
    mask_cols = bool(num_v_blocks * tv != n_words)

    tgt2d = target.astype(jnp.int32).reshape(n_rows, 1)

    kernel = functools.partial(
        _ls_ce_kernel,
        n_words=int(n_words), n_rows=int(n_rows),
        block_rows=int(br), block_cols=int(tv), mask_cols=mask_cols)

    partials = pl.pallas_call(
        kernel,
        out_shape=jax.ShapeDtypeStruct((num_row_blocks, 8, 128), jnp.float32),
        grid_spec=pltpu.PrefetchScalarGridSpec(
            num_scalar_prefetch=0,
            grid=(num_row_blocks, num_v_blocks),
            in_specs=[
                pl.BlockSpec((br, tv), lambda i, v: (i, v)),
                pl.BlockSpec((br, 1), lambda i, v: (i, 0)),
            ],
            out_specs=pl.BlockSpec((1, 8, 128), lambda i, v: (i, 0, 0)),
            scratch_shapes=[pltpu.VMEM((br, 1), jnp.float32)] * 4,
        ),
        compiler_params=pltpu.CompilerParams(
            dimension_semantics=("parallel", "arbitrary"),
            vmem_limit_bytes=vmem_limit),
        cost_estimate=pl.CostEstimate(
            flops=6 * n_rows * n_words,
            transcendentals=n_rows * n_words,
            bytes_accessed=(n_rows * n_words * itemsize + n_rows * 4
                            + num_row_blocks * 8 * 128 * 4)),
    )(x, tgt2d)

    nll_total = jnp.sum(partials[:, 0, 0])
    smooth_total = jnp.sum(partials[:, 0, 1])
    eps_i = smoothing / n_words
    loss = (1.0 - smoothing) * nll_total + eps_i * smooth_total
    return loss / jnp.float32(n_rows)


def _reference(x, target, smoothing, n_words):
    # Pure-JAX reference matching the PyTorch module exactly.
    scores = jax.nn.log_softmax(x.astype(jnp.float32), axis=-1)
    nll = -jnp.take_along_axis(scores, target[:, None].astype(jnp.int32), axis=-1)
    smooth = -jnp.sum(scores, axis=-1, keepdims=True)
    eps_i = smoothing / n_words
    loss = (1.0 - smoothing) * jnp.sum(nll) + eps_i * jnp.sum(smooth)
    return loss / x.shape[0]


if __name__ == "__main__":
    key = jax.random.PRNGKey(0)
    kx, kt = jax.random.split(key)

    N, V = 24, 200            # rows, vocab (self.n_words); V not a mult of 128
    smoothing = 0.1

    x = jax.random.normal(kx, (N, V), dtype=jnp.float32)
    target = jax.random.randint(kt, (N,), 0, V, dtype=jnp.int32)
    ref = _reference(x, target, smoothing, V)

    # 1) Auto config: single full-vocab block, no padding anywhere.
    loss = jax.block_until_ready(
        label_smoothing_cross_entropy(x, target, smoothing=smoothing))
    assert jnp.allclose(loss, ref, rtol=1e-4, atol=1e-4), (loss, ref)

    # 2) Multiple row blocks (full-vocab width), parallel partials.
    loss_b = jax.block_until_ready(
        label_smoothing_cross_entropy(x, target, smoothing=smoothing,
                                      block_rows=8))
    assert jnp.allclose(loss_b, ref, rtol=1e-4, atol=1e-4), (loss_b, ref)

    # 3) Vocab-tiled online-softmax path with a partial (masked) last V block.
    loss_v = jax.block_until_ready(
        label_smoothing_cross_entropy(x, target, smoothing=smoothing,
                                      block_rows=8, block_cols=128))
    assert jnp.allclose(loss_v, ref, rtol=1e-4, atol=1e-4), (loss_v, ref)

    # 4) N not a multiple of the row tile: exercises the in-kernel row mask.
    n_odd = 13
    ref_c = _reference(x[:n_odd], target[:n_odd], smoothing, V)
    loss_c = jax.block_until_ready(
        label_smoothing_cross_entropy(x[:n_odd], target[:n_odd],
                                      smoothing=smoothing))
    assert jnp.allclose(loss_c, ref_c, rtol=1e-4, atol=1e-4), (loss_c, ref_c)

    # 5) bf16 logits (native-dtype max, f32 exp/sums inside the kernel).
    xb = x.astype(jnp.bfloat16)
    ref_bf = _reference(xb, target, smoothing, V)
    loss_bf = jax.block_until_ready(
        label_smoothing_cross_entropy(xb, target, smoothing=smoothing))
    assert jnp.allclose(loss_bf, ref_bf, rtol=1e-3, atol=1e-3), (loss_bf, ref_bf)

    print("KERNEL_OK")
</pallas_src>

<mosaic_0001>
module attributes {stable_mosaic.version = 11 : i64} {
  func.func @_ls_ce_kernel(%arg0: i32, %arg1: i32, %arg2: memref<24x200xf32, #tpu.memory_space<vmem>>, %arg3: memref<24x1xi32, #tpu.memory_space<vmem>>, %arg4: memref<1x8x128xf32, #tpu.memory_space<vmem>>, %arg5: memref<24x1xf32, #tpu.memory_space<vmem>>, %arg6: memref<24x1xf32, #tpu.memory_space<vmem>>, %arg7: memref<24x1xf32, #tpu.memory_space<vmem>>, %arg8: memref<24x1xf32, #tpu.memory_space<vmem>>) attributes {dimension_semantics = [#tpu.dimension_semantics<parallel>, #tpu.dimension_semantics<arbitrary>], iteration_bounds = array<i64: 1, 1>, scalar_prefetch = 0 : i64, scratch_operands = 4 : i64, tpu.core_type = #tpu.core_type<tc>, window_params = [{transform_indices = @transform_0, window_bounds = array<i64: 24, 200>}, {transform_indices = @transform_1, window_bounds = array<i64: 24, 1>}, {transform_indices = @transform_2, window_bounds = array<i64: 1, 8, 128>}]} {
    %c0_i32 = arith.constant 0 : i32
    %0 = arith.cmpi eq, %arg1, %c0_i32 : i32
    %1 = arith.extui %0 : i1 to i32
    %c0_i32_0 = arith.constant 0 : i32
    %2 = arith.cmpi ne, %1, %c0_i32_0 : i32
    scf.if %2 {
      %cst_32 = arith.constant -1.000000e+30 : f32
      %45 = vector.broadcast %cst_32 : f32 to vector<24x1xf32>
      %c0_33 = arith.constant 0 : index
      %c0_34 = arith.constant 0 : index
      %46 = vector.load %arg5[%c0_33, %c0_34] : memref<24x1xf32, #tpu.memory_space<vmem>>, vector<24x1xf32>
      tpu.vector_store %arg5[%c0_33, %c0_34], %45 {strides = array<i32>} : memref<24x1xf32, #tpu.memory_space<vmem>>, vector<24x1xf32>,
      %cst_35 = arith.constant 0.000000e+00 : f32
      %47 = vector.broadcast %cst_35 : f32 to vector<24x1xf32>
      %c0_36 = arith.constant 0 : index
      %c0_37 = arith.constant 0 : index
      %48 = vector.load %arg6[%c0_36, %c0_37] : memref<24x1xf32, #tpu.memory_space<vmem>>, vector<24x1xf32>
      tpu.vector_store %arg6[%c0_36, %c0_37], %47 {strides = array<i32>} : memref<24x1xf32, #tpu.memory_space<vmem>>, vector<24x1xf32>,
      %cst_38 = arith.constant 0.000000e+00 : f32
      %49 = vector.broadcast %cst_38 : f32 to vector<24x1xf32>
      %c0_39 = arith.constant 0 : index
      %c0_40 = arith.constant 0 : index
      %50 = vector.load %arg7[%c0_39, %c0_40] : memref<24x1xf32, #tpu.memory_space<vmem>>, vector<24x1xf32>
      tpu.vector_store %arg7[%c0_39, %c0_40], %49 {strides = array<i32>} : memref<24x1xf32, #tpu.memory_space<vmem>>, vector<24x1xf32>,
      %cst_41 = arith.constant 0.000000e+00 : f32
      %51 = vector.broadcast %cst_41 : f32 to vector<24x1xf32>
      %c0_42 = arith.constant 0 : index
      %c0_43 = arith.constant 0 : index
      %52 = vector.load %arg8[%c0_42, %c0_43] : memref<24x1xf32, #tpu.memory_space<vmem>>, vector<24x1xf32>
      tpu.vector_store %arg8[%c0_42, %c0_43], %51 {strides = array<i32>} : memref<24x1xf32, #tpu.memory_space<vmem>>, vector<24x1xf32>,
    } else {
    }
    %c0 = arith.constant 0 : index
    %c0_1 = arith.constant 0 : index
    %3 = vector.load %arg2[%c0, %c0_1] : memref<24x200xf32, #tpu.memory_space<vmem>>, vector<24x200xf32>
    %cst = arith.constant dense<0xFF800000> : vector<24xf32>
    %4 = vector.multi_reduction <maximumf>, %3, %cst [1] : vector<24x200xf32> to vector<24xf32>
    %5 = vector.shape_cast %4 : vector<24xf32> to vector<24x1xf32>
    %c0_2 = arith.constant 0 : index
    %c0_3 = arith.constant 0 : index
    %6 = vector.load %arg5[%c0_2, %c0_3] : memref<24x1xf32, #tpu.memory_space<vmem>>, vector<24x1xf32>
    %7 = arith.maximumf %6, %5 : vector<24x1xf32>
    %c0_4 = arith.constant 0 : index
    %c0_5 = arith.constant 0 : index
    %8 = vector.load %arg2[%c0_4, %c0_5] : memref<24x200xf32, #tpu.memory_space<vmem>>, vector<24x200xf32>
    %9 = vector.broadcast %7 : vector<24x1xf32> to vector<24x200xf32>
    %10 = arith.subf %8, %9 : vector<24x200xf32>
    %11 = math.exp %10 : vector<24x200xf32>
    %cst_6 = arith.constant dense<0.000000e+00> : vector<24xf32>
    %12 = vector.multi_reduction <add>, %11, %cst_6 [1] : vector<24x200xf32> to vector<24xf32>
    %13 = vector.shape_cast %12 : vector<24xf32> to vector<24x1xf32>
    %c0_7 = arith.constant 0 : index
    %c0_8 = arith.constant 0 : index
    %14 = vector.load %arg6[%c0_7, %c0_8] : memref<24x1xf32, #tpu.memory_space<vmem>>, vector<24x1xf32>
    %15 = arith.subf %6, %7 : vector<24x1xf32>
    %16 = math.exp %15 : vector<24x1xf32>
    %17 = arith.mulf %14, %16 : vector<24x1xf32>
    %18 = arith.addf %17, %13 : vector<24x1xf32>
    %c0_9 = arith.constant 0 : index
    %c0_10 = arith.constant 0 : index
    %19 = vector.load %arg6[%c0_9, %c0_10] : memref<24x1xf32, #tpu.memory_space<vmem>>, vector<24x1xf32>
    tpu.vector_store %arg6[%c0_9, %c0_10], %18 {strides = array<i32>} : memref<24x1xf32, #tpu.memory_space<vmem>>, vector<24x1xf32>,
    %c0_11 = arith.constant 0 : index
    %c0_12 = arith.constant 0 : index
    %20 = vector.load %arg5[%c0_11, %c0_12] : memref<24x1xf32, #tpu.memory_space<vmem>>, vector<24x1xf32>
    tpu.vector_store %arg5[%c0_11, %c0_12], %7 {strides = array<i32>} : memref<24x1xf32, #tpu.memory_space<vmem>>, vector<24x1xf32>,
    %c0_13 = arith.constant 0 : index
    %c0_14 = arith.constant 0 : index
    %21 = vector.load %arg2[%c0_13, %c0_14] : memref<24x200xf32, #tpu.memory_space<vmem>>, vector<24x200xf32>
    %cst_15 = arith.constant dense<0.000000e+00> : vector<24xf32>
    %22 = vector.multi_reduction <add>, %21, %cst_15 [1] : vector<24x200xf32> to vector<24xf32>
    %23 = vector.shape_cast %22 : vector<24xf32> to vector<24x1xf32>
    %c0_16 = arith.constant 0 : index
    %c0_17 = arith.constant 0 : index
    %24 = vector.load %arg7[%c0_16, %c0_17] : memref<24x1xf32, #tpu.memory_space<vmem>>, vector<24x1xf32>
    %25 = arith.addf %24, %23 : vector<24x1xf32>
    %c0_18 = arith.constant 0 : index
    %c0_19 = arith.constant 0 : index
    %26 = vector.load %arg7[%c0_18, %c0_19] : memref<24x1xf32, #tpu.memory_space<vmem>>, vector<24x1xf32>
    tpu.vector_store %arg7[%c0_18, %c0_19], %25 {strides = array<i32>} : memref<24x1xf32, #tpu.memory_space<vmem>>, vector<24x1xf32>,
    %c0_20 = arith.constant 0 : index
    %c0_21 = arith.constant 0 : index
    %27 = vector.load %arg8[%c0_20, %c0_21] : memref<24x1xf32, #tpu.memory_space<vmem>>, vector<24x1xf32>
    %c200_i32 = arith.constant 200 : i32
    %28 = arith.muli %arg1, %c200_i32 : i32
    %29 = tpu.iota {dimensions = array<i32: 1>} : vector<24x200xi32>
    %30 = vector.broadcast %28 : i32 to vector<24x200xi32>
    %31 = arith.addi %30, %29 : vector<24x200xi32>
    %c0_22 = arith.constant 0 : index
    %c0_23 = arith.constant 0 : index
    %32 = vector.load %arg3[%c0_22, %c0_23] : memref<24x1xi32, #tpu.memory_space<vmem>>, vector<24x1xi32>
    %33 = vector.broadcast %32 : vector<24x1xi32> to vector<24x200xi32>
    %34 = arith.cmpi eq, %31, %33 : vector<24x200xi32>
    %c0_24 = arith.constant 0 : index
    %c0_25 = arith.constant 0 : index
    %35 = vector.load %arg2[%c0_24, %c0_25] : memref<24x200xf32, #tpu.memory_space<vmem>>, vector<24x200xf32>
    %cst_26 = arith.constant 0.000000e+00 : f32
    %36 = vector.broadcast %cst_26 : f32 to vector<24x200xf32>
    %37 = arith.select %34, %35, %36 : vector<24x200xi1>, vector<24x200xf32>
    %cst_27 = arith.constant dense<0.000000e+00> : vector<24xf32>
    %38 = vector.multi_reduction <add>, %37, %cst_27 [1] : vector<24x200xf32> to vector<24xf32>
    %39 = vector.shape_cast %38 : vector<24xf32> to vector<24x1xf32>
    %40 = arith.addf %27, %39 : vector<24x1xf32>
    %c0_28 = arith.constant 0 : index
    %c0_29 = arith.constant 0 : index
    %41 = vector.load %arg8[%c0_28, %c0_29] : memref<24x1xf32, #tpu.memory_space<vmem>>, vector<24x1xf32>
    tpu.vector_store %arg8[%c0_28, %c0_29], %40 {strides = array<i32>} : memref<24x1xf32, #tpu.memory_space<vmem>>, vector<24x1xf32>,
    %c0_i32_30 = arith.constant 0 : i32
    %42 = arith.cmpi eq, %arg1, %c0_i32_30 : i32
    %43 = arith.extui %42 : i1 to i32
    %c0_i32_31 = arith.constant 0 : i32
    %44 = arith.cmpi ne, %43, %c0_i32_31 : i32
    scf.if %44 {
      %c0_32 = arith.constant 0 : index
      %c0_33 = arith.constant 0 : index
      %45 = vector.load %arg5[%c0_32, %c0_33] : memref<24x1xf32, #tpu.memory_space<vmem>>, vector<24x1xf32>
      %c0_34 = arith.constant 0 : index
      %c0_35 = arith.constant 0 : index
      %46 = vector.load %arg6[%c0_34, %c0_35] : memref<24x1xf32, #tpu.memory_space<vmem>>, vector<24x1xf32>
      %47 = math.log %46 : vector<24x1xf32>
      %48 = arith.addf %45, %47 : vector<24x1xf32>
      %c0_36 = arith.constant 0 : index
      %c0_37 = arith.constant 0 : index
      %49 = vector.load %arg8[%c0_36, %c0_37] : memref<24x1xf32, #tpu.memory_space<vmem>>, vector<24x1xf32>
      %50 = arith.subf %48, %49 : vector<24x1xf32>
      %cst_38 = arith.constant 2.000000e+02 : f32
      %51 = vector.broadcast %cst_38 : f32 to vector<24x1xf32>
      %52 = arith.mulf %51, %48 : vector<24x1xf32>
      %c0_39 = arith.constant 0 : index
      %c0_40 = arith.constant 0 : index
      %53 = vector.load %arg7[%c0_39, %c0_40] : memref<24x1xf32, #tpu.memory_space<vmem>>, vector<24x1xf32>
      %54 = arith.subf %52, %53 : vector<24x1xf32>
      %55 = tpu.iota {dimensions = array<i32: 0>} : vector<24x1xi32>
      %c24_i32 = arith.constant 24 : i32
      %56 = arith.muli %arg0, %c24_i32 : i32
      %57 = vector.broadcast %56 : i32 to vector<24x1xi32>
      %58 = arith.addi %57, %55 : vector<24x1xi32>
      %c24_i32_41 = arith.constant 24 : i32
      %59 = vector.broadcast %c24_i32_41 : i32 to vector<24x1xi32>
      %60 = arith.cmpi slt, %58, %59 : vector<24x1xi32>
      %cst_42 = arith.constant 0.000000e+00 : f32
      %61 = vector.broadcast %cst_42 : f32 to vector<24x1xf32>
      %62 = arith.select %60, %50, %61 : vector<24x1xi1>, vector<24x1xf32>
      %cst_43 = arith.constant 0.000000e+00 : f32
      %63 = vector.broadcast %cst_43 : f32 to vector<24x1xf32>
      %64 = arith.select %60, %54, %63 : vector<24x1xi1>, vector<24x1xf32>
      %65 = vector.shape_cast %62 : vector<24x1xf32> to vector<1x24x1xf32>
      %cst_44 = arith.constant dense<0.000000e+00> : vector<1xf32>
      %66 = vector.multi_reduction <add>, %65, %cst_44 [1, 2] : vector<1x24x1xf32> to vector<1xf32>
      %67 = vector.shape_cast %66 : vector<1xf32> to vector<1x1x1xf32>
      %68 = vector.extract %67[0, 0, 0] : f32 from vector<1x1x1xf32>
      %69 = vector.shape_cast %64 : vector<24x1xf32> to vector<1x24x1xf32>
      %cst_45 = arith.constant dense<0.000000e+00> : vector<1xf32>
      %70 = vector.multi_reduction <add>, %69, %cst_45 [1, 2] : vector<1x24x1xf32> to vector<1xf32>
      %71 = vector.shape_cast %70 : vector<1xf32> to vector<1x1x1xf32>
      %72 = vector.extract %71[0, 0, 0] : f32 from vector<1x1x1xf32>
      %73 = tpu.iota {dimensions = array<i32: 1>} : vector<1x8x128xi32>
      %74 = tpu.iota {dimensions = array<i32: 2>} : vector<1x8x128xi32>
      %c0_i32_46 = arith.constant 0 : i32
      %75 = vector.broadcast %c0_i32_46 : i32 to vector<1x8x128xi32>
      %76 = arith.cmpi eq, %74, %75 : vector<1x8x128xi32>
      %c1_i32 = arith.constant 1 : i32
      %77 = vector.broadcast %c1_i32 : i32 to vector<1x8x128xi32>
      %78 = arith.cmpi eq, %74, %77 : vector<1x8x128xi32>
      %cst_47 = arith.constant 0.000000e+00 : f32
      %79 = vector.broadcast %72 : f32 to vector<1x8x128xf32>
      %80 = vector.broadcast %cst_47 : f32 to vector<1x8x128xf32>
      %81 = arith.select %78, %79, %80 : vector<1x8x128xi1>, vector<1x8x128xf32>
      %82 = vector.broadcast %68 : f32 to vector<1x8x128xf32>
      %83 = arith.select %76, %82, %81 : vector<1x8x128xi1>, vector<1x8x128xf32>
      %c0_i32_48 = arith.constant 0 : i32
      %84 = vector.broadcast %c0_i32_48 : i32 to vector<1x8x128xi32>
      %85 = arith.cmpi eq, %73, %84 : vector<1x8x128xi32>
      %cst_49 = arith.constant 0.000000e+00 : f32
      %86 = vector.broadcast %cst_49 : f32 to vector<1x8x128xf32>
      %87 = arith.select %85, %83, %86 : vector<1x8x128xi1>, vector<1x8x128xf32>
      %c0_50 = arith.constant 0 : index
      %c0_51 = arith.constant 0 : index
      %c0_52 = arith.constant 0 : index
      %88 = vector.load %arg4[%c0_50, %c0_51, %c0_52] : memref<1x8x128xf32, #tpu.memory_space<vmem>>, vector<1x8x128xf32>
      tpu.vector_store %arg4[%c0_50, %c0_51, %c0_52], %87 {strides = array<i32>} : memref<1x8x128xf32, #tpu.memory_space<vmem>>, vector<1x8x128xf32>,
    } else {
    }
    return
  }
  func.func @transform_0(%arg0: i32, %arg1: i32) -> (i32, i32) {
    %c0_i32 = arith.constant 0 : i32
    return %arg0, %arg1 : i32, i32
  }
  func.func @transform_1(%arg0: i32, %arg1: i32) -> (i32, i32) {
    %c0_i32 = arith.constant 0 : i32
    %c0_i32_0 = arith.constant 0 : i32
    return %arg0, %c0_i32 : i32, i32
  }
  func.func @transform_2(%arg0: i32, %arg1: i32) -> (i32, i32, i32) {
    %c0_i32 = arith.constant 0 : i32
    %c0_i32_0 = arith.constant 0 : i32
    %c0_i32_1 = arith.constant 0 : i32
    return %arg0, %c0_i32, %c0_i32_0 : i32, i32, i32
  }
}

</mosaic_0001>

<bundles_post_ra>
// kernel: tpu_custom_call.1
= control target key start
LH: loop header
LB: loop body
LE: loop exit
PB: predicated region body
PF: predicated region fallthrough
CT: control target
= control target key end

     0   :  { %7 = vsyncpa [#allocation7], 0  ;;  %s590_s0 = inlined_call_operand.hbm [shape: f32[24,200], index: 0, kind: input, shape index: {}]   ;;  %s591_s1 = inlined_call_operand.vmem [shape: s32[24,1], index: 1, kind: input, shape index: {}]   ;;  %s592_s2 = inlined_call_operand.hbm [shape: f32[1,8,128], index: 2, kind: output, shape index: {}]  }
   0x1   :  { %8 = vsyncpa [#allocation8], 0  ;;  %s411_s9 = smov [#allocation6]   ;;  %s363_s13 = scalar_lea.hbm %s590_s0, 768 }
   0x2   :  { %s14_s10 = sshll.u32 %s411_s9, 4  ;;  %p364_p0 = scmp.ne.s32.totalorder %s590_s0, %s363_s13  ;;  %s15_s10 = int_to_ptr.vmem [resolvable:$true] %s14_s10 }
   0x3   :  { %p367_p1 = scmp.lt.u32.totalorder %s363_s13, %s590_s0 }
   0x5   :  { %p369_p2 = pnand %p367_p1, %p364_p0 }
   0x7   :  { %372 = shalt.err (!%p369_p2)
}
   0x8   :  { %s373_s18 = scalar_lea.vmem %s15_s10, 768  ;;  %p378_p4 = scmp.lt.s32.totalorder %s15_s10, %s15_s10 }
   0x9   :  { %p374_p3 = scmp.ne.s32.totalorder %s15_s10, %s373_s18  ;;  %p379_p5 = scmp.lt.s32.totalorder %s373_s18, %s373_s18 }
   0xb   :  { %p380_p6 = por %p379_p5, %p378_p4 }
   0xd   :  { %p381_p7 = pnand %p380_p6, %p374_p3 }
   0xf   :  { %384 = shalt.err (!%p381_p7)
}
  0x10   :  { %s412_s19 = smov 256   ;;  %s413_s20 = smov 16  }
  0x11   :  { %20 = dma.hbm_to_vmem [thread:$0]  %s590_s0, 768, %s15_s10, [#allocation7], %s412_s19, %s412_s19, %s413_s20  }
  0x12   :  { %407 = dma.done.wait [#allocation7], 768  }
  0x13   :  { %408 = vsyncadd [#allocation7], 4294966528  ;;  %vm30_vm0 = vcmask 7168   ;;  %v414_v0 = vmov -1e+30   ;;  %vm49_vm1 = vcmask 588800   ;;  %v169_v37 = vlaneseq }
  0x14   :  { %31 = vst.msk [vmem:[#allocation2] sm:$0xff] %vm30_vm0, %v414_v0  ;;  %32 = vst.msk [vmem:[#allocation2 + $0x8] sm:$0xff] %vm30_vm0, %v414_v0  ;;  %v448_v1 = vld [vmem:[#allocation6] sm:$0xff]  ;;  %v450_v2 = vld [vmem:[#allocation6 + $0x8] sm:$0xff]  ;;  %v415_v13 = vmov 0   ;;  %v416_v14 = vmov 0.0  }
  0x15   :  { %33 = vst.msk [vmem:[#allocation2 + $0x10] sm:$0xff] %vm30_vm0, %v414_v0  ;;  %v452_v3 = vld [vmem:[#allocation6 + $0x20] sm:$0xff]  ;;  %v50_v4 = vsel %vm49_vm1, %v450_v2, -inf  ;;  %v456_v5 = vld [vmem:[#allocation6 + $0x28] sm:$0xff]  ;;  %v458_v6 = vld [vmem:[#allocation6 + $0x10] sm:$0xff]  ;;  %337 = vset.pattern.permute.xlu1 %v415_v13  ;;  %338 = vset.pattern.permute.xlu0 %v415_v13  ;;  %v524_v46 = vand.u32 127, %v169_v37 }
  0x16   :  { %v460_v7 = vld [vmem:[#allocation6 + $0x18] sm:$0xff]  ;;  %v51_v8 = vmax.f32 %v448_v1, %v50_v4  ;;  %v58_v9 = vsel %vm49_vm1, %v456_v5, -inf  ;;  %34 = vst.msk [vmem:[#allocation3] sm:$0xff] %vm30_vm0, %v416_v14  ;;  %35 = vst.msk [vmem:[#allocation3 + $0x8] sm:$0xff] %vm30_vm0, %v416_v14  ;;  %v175_v27 = vld [vmem:[%s591_s1] sm:$0xff]  ;;  %v144_v62 = vsel %vm49_vm1, %v450_v2, 0.0 }
  0x17   :  { %v54_v10 = vsel %vm49_vm1, %v460_v7, -inf  ;;  %v59_v11 = vmax.f32 %v452_v3, %v58_v9  ;;  %36 = vst.msk [vmem:[#allocation3 + $0x10] sm:$0xff] %vm30_vm0, %v416_v14  ;;  %37 = vst.msk [vmem:[#allocation4] sm:$0xff] %vm30_vm0, %v416_v14  ;;  %v176_v28 = vld [vmem:[%s591_s1 + $0x8] sm:$0xff]  ;;  %v177_v29 = vld [vmem:[%s591_s1 + $0x10] sm:$0xff]  ;;  %v171_v47 = vadd.s32 128, %v524_v46  ;;  %v145_v9 = vadd.f32 %v144_v62, %v448_v1 }
  0x18   :  { %52 = vmax.xlane.f32.xlu0 %v51_v8  ;;  %v55_v12 = vmax.f32 %v458_v6, %v54_v10  ;;  %38 = vst.msk [vmem:[#allocation4 + $0x8] sm:$0xff] %vm30_vm0, %v416_v14  ;;  %39 = vst.msk [vmem:[#allocation4 + $0x10] sm:$0xff] %vm30_vm0, %v416_v14  ;;  %v152_v8 = vsel %vm49_vm1, %v456_v5, 0.0  ;;  %vm303_vm8 = vcmp.eq.s32.totalorder %v524_v46, 1  ;;  %vm302_vm9 = vcmp.eq.s32.totalorder %v524_v46, 0  ;;  %s417_s29 = smov [#allocation9]  }
  0x19   :  { %60 = vmax.xlane.f32.xlu1 %v59_v11  ;;  %40 = vst.msk [vmem:[#allocation5] sm:$0xff] %vm30_vm0, %v416_v14  ;;  %41 = vst.msk [vmem:[#allocation5 + $0x8] sm:$0xff] %vm30_vm0, %v416_v14  ;;  %v148_v11 = vsel %vm49_vm1, %v460_v7, 0.0  ;;  %s317_s30 = sshll.u32 %s417_s29, 4  ;;  %s318_s30 = int_to_ptr.vmem [resolvable:$true] %s317_s30 }
  0x1a   :  { %42 = vst.msk [vmem:[#allocation5 + $0x10] sm:$0xff] %vm30_vm0, %v416_v14  ;;  %v149_v14 = vadd.f32 %v148_v11, %v458_v6  ;;  %s385_s3 = scalar_lea.vmem %s318_s30, 128  ;;  %p390_p9 = scmp.lt.s32.totalorder %s318_s30, %s318_s30 }
  0x1b   :  { %v478_v15 = vld [vmem:[#allocation2] sm:$0xff]  ;;  %v488_v21 = vld [vmem:[#allocation2 + $0x8] sm:$0xff]  ;;  %p386_p8 = scmp.ne.s32.totalorder %s318_s30, %s385_s3  ;;  %p391_p10 = scmp.lt.s32.totalorder %s385_s3, %s385_s3 }
  0x1c   :  { %56 = vmax.xlane.f32.xlu0 %v55_v12  ;;  %v480_v16 = vld [vmem:[#allocation2 + $0x10] sm:$0xff] }
  0x1d   :  { %p392_p11 = por %p391_p10, %p390_p9 }
  0x1f   :  { %p393_p12 = pnand %p392_p11, %p386_p8 }
  0xa5   :  { %v53_v17 = vpop.xlane.xlu0 %52 }
  0xa6   :  { %v483_v18 = vmax.f32 %v478_v15, %v53_v17  ;;  %v61_v19 = vpop.xlane.xlu1 %60 }
  0xa7   :  { %v486_v20 = vmax.f32 %v480_v16, %v61_v19 }
  0xa8   :  { %v116_v22 = vsub.f32 %v478_v15, %v483_v18  ;;  %135 = vst.msk [vmem:[#allocation2] sm:$0xff] %vm30_vm0, %v483_v18  ;;  %70 = vperm.xlu1 %337, %v483_v18   ;;  %v115_v18 = vld [vmem:[#allocation3 + $0x10] sm:$0xff] }
  0xa9   :  { %v118_v23 = vsub.f32 %v480_v16, %v486_v20  ;;  %137 = vst.msk [vmem:[#allocation2 + $0x10] sm:$0xff] %vm30_vm0, %v486_v20  ;;  %v57_v24 = vpop.xlane.xlu0 %56  ;;  %v165_v16 = vld [vmem:[#allocation5] sm:$0xff] }
  0xaa   :  { %v500_v25 = vmax.f32 %v488_v21, %v57_v24 }
  0xac   :  { %v117_v26 = vsub.f32 %v488_v21, %v500_v25  ;;  %136 = vst.msk [vmem:[#allocation2 + $0x8] sm:$0xff] %vm30_vm0, %v500_v25  ;;  %75 = vperm.xlu0 %338, %v500_v25   ;;  %80 = vperm.xlu1 %337, %v486_v20  }
  0xb0   :  { %179 = vperm.xlu1 %337, %v175_v27  }
  0xb4   :  { %182 = vperm.xlu1 %337, %v176_v28  }
  0xb8   :  { %185 = vperm.xlu1 %337, %v177_v29   ;;  %v119_v29 = vmul.f32 1.442695, %v116_v22 }
 0x127   :  { %v71_v30 = vpop.permute.xlu1 %70 }
 0x128   :  { %v83_v31 = vsub.f32 %v448_v1, %v71_v30  ;;  %v84_v32 = vsub.f32 %v450_v2, %v71_v30  ;;  %v113_v30 = vld [vmem:[#allocation3] sm:$0xff] }
 0x12a   :  { %v89_v33 = vmul.f32 1.442695, %v83_v31  ;;  %v91_v34 = vmul.f32 1.442695, %v84_v32 }
 0x12b   :  { %v76_v35 = vpop.permute.xlu0 %75  ;;  %v81_v36 = vpop.permute.xlu1 %80 }
 0x12c   :  { %339 = vpow2.f32 %v89_v33  ;;  %v85_v38 = vsub.f32 %v458_v6, %v76_v35  ;;  %v86_v39 = vsub.f32 %v460_v7, %v76_v35  ;;  %v87_v40 = vsub.f32 %v452_v3, %v81_v36 }
 0x12d   :  { %341 = vpow2.f32 %v91_v34  ;;  %v88_v41 = vsub.f32 %v456_v5, %v81_v36  ;;  %v114_v34 = vld [vmem:[#allocation3 + $0x8] sm:$0xff] }
 0x12e   :  { %v93_v42 = vmul.f32 1.442695, %v85_v38  ;;  %v95_v43 = vmul.f32 1.442695, %v86_v39  ;;  %v97_v44 = vmul.f32 1.442695, %v87_v40 }
 0x12f   :  { %v99_v45 = vmul.f32 1.442695, %v88_v41  ;;  %v180_v48 = vpop.permute.xlu1 %179  ;;  %v156_v38 = vld [vmem:[#allocation4] sm:$0xff]  ;;  %v158_v41 = vld [vmem:[#allocation4 + $0x10] sm:$0xff] }
 0x130   :  { %343 = vpow2.f32 %v93_v42  ;;  %vm188_vm2 = vcmp.eq.s32.totalorder %v171_v47, %v180_v48  ;;  %vm187_vm3 = vcmp.eq.s32.totalorder %v524_v46, %v180_v48 }
 0x131   :  { %345 = vpow2.f32 %v95_v43  ;;  %v200_v55 = vsel %vm188_vm2, %v450_v2, 0.0  ;;  %v199_v63 = vsel %vm187_vm3, %v448_v1, 0.0  ;;  %v153_v2 = vadd.f32 %v152_v8, %v452_v3  ;;  %v227_v8 = vld [vmem:[#allocation2 + $0x8] sm:$0xff] }
 0x132   :  { %347 = vpow2.f32 %v97_v44  ;;  %v205_v0 = vsel %vm49_vm1, %v200_v55, 0.0  ;;  %v157_v44 = vld [vmem:[#allocation4 + $0x8] sm:$0xff] }
 0x133   :  { %349 = vpow2.f32 %v99_v45  ;;  %v183_v59 = vpop.permute.xlu1 %182  ;;  %v206_v10 = vadd.f32 %v205_v0, %v199_v63  ;;  %v167_v55 = vld [vmem:[#allocation5 + $0x10] sm:$0xff] }
 0x134   :  { %vm190_vm4 = vcmp.eq.s32.totalorder %v171_v47, %v183_v59  ;;  %vm189_vm5 = vcmp.eq.s32.totalorder %v524_v46, %v183_v59  ;;  %351 = vpow2.f32 %v119_v29 }
 0x135   :  { %v202_v13 = vsel %vm190_vm4, %v460_v7, 0.0  ;;  %v201_v1 = vsel %vm189_vm5, %v458_v6, 0.0  ;;  %v121_v6 = vmul.f32 1.442695, %v117_v26 }
 0x136   :  { %v340_v49 = vpop.eup %339  ;;  %v209_v17 = vsel %vm49_vm1, %v202_v13, 0.0 }
 0x137   :  { %v342_v50 = vpop.eup %341  ;;  %v186_v12 = vpop.permute.xlu1 %185  ;;  %v210_v24 = vadd.f32 %v209_v17, %v201_v1  ;;  %353 = vpow2.f32 %v121_v6 }
 0x138   :  { %v101_v51 = vsel %vm49_vm1, %v342_v50, 0.0  ;;  %vm192_vm6 = vcmp.eq.s32.totalorder %v171_v47, %v186_v12  ;;  %vm191_vm7 = vcmp.eq.s32.totalorder %v524_v46, %v186_v12 }
 0x139   :  { %v102_v52 = vadd.f32 %v340_v49, %v101_v51  ;;  %v204_v19 = vsel %vm192_vm6, %v456_v5, 0.0  ;;  %v203_v27 = vsel %vm191_vm7, %v452_v3, 0.0  ;;  %v123_v5 = vmul.f32 1.442695, %v118_v23  ;;  %v166_v51 = vld [vmem:[#allocation5 + $0x8] sm:$0xff] }
 0x13a   :  { %v344_v53 = vpop.eup %343  ;;  %v213_v28 = vsel %vm49_vm1, %v204_v19, 0.0 }
 0x13b   :  { %v346_v54 = vpop.eup %345  ;;  %103 = vadd.xlane.f32.xlu1 %v102_v52  ;;  %v214_v7 = vadd.f32 %v213_v28, %v203_v27  ;;  %355 = vpow2.f32 %v123_v5 }
 0x13c   :  { %v348_v56 = vpop.eup %347  ;;  %v105_v57 = vsel %vm49_vm1, %v346_v54, 0.0 }
 0x13d   :  { %v350_v58 = vpop.eup %349  ;;  %v106_v60 = vadd.f32 %v344_v53, %v105_v57 }
 0x13e   :  { %v109_v61 = vsel %vm49_vm1, %v350_v58, 0.0  ;;  %v352_v3 = vpop.eup %351 }
 0x13f   :  { %107 = vadd.xlane.f32.xlu0 %v106_v60  ;;  %v110_v4 = vadd.f32 %v348_v56, %v109_v61  ;;  %v125_v31 = vmul.f32 %v352_v3, %v113_v30  ;;  %v226_v60 = vld [vmem:[#allocation2] sm:$0xff] }
 0x141   :  { %111 = vadd.xlane.f32.xlu1 %v110_v4  ;;  %v354_v32 = vpop.eup %353 }
 0x142   :  { %v126_v22 = vmul.f32 %v354_v32, %v114_v34 }
 0x143   :  { %207 = vadd.xlane.f32.xlu0 %v206_v10 }
 0x145   :  { %146 = vadd.xlane.f32.xlu1 %v145_v9  ;;  %v356_v15 = vpop.eup %355 }
 0x146   :  { %v127_v26 = vmul.f32 %v356_v15, %v115_v18 }
 0x147   :  { %154 = vadd.xlane.f32.xlu0 %v153_v2  ;;  %v228_v2 = vld [vmem:[#allocation2 + $0x10] sm:$0xff] }
 0x149   :  { %150 = vadd.xlane.f32.xlu1 %v149_v14 }
 0x14d   :  { %211 = vadd.xlane.f32.xlu1 %v210_v24 }
 0x151   :  { %215 = vadd.xlane.f32.xlu1 %v214_v7 }
 0x1c8   :  { %v104_v33 = vpop.xlane.xlu1 %103 }
 0x1c9   :  { %v128_v35 = vadd.f32 %v125_v31, %v104_v33 }
 0x1cb   :  { %132 = vst.msk [vmem:[#allocation3] sm:$0xff] %vm30_vm0, %v128_v35 }
 0x1cc   :  { %v108_v21 = vpop.xlane.xlu0 %107 }
 0x1cd   :  { %v129_v25 = vadd.f32 %v126_v22, %v108_v21 }
 0x1ce   :  { %v112_v36 = vpop.xlane.xlu1 %111 }
 0x1cf   :  { %133 = vst.msk [vmem:[#allocation3 + $0x8] sm:$0xff] %vm30_vm0, %v129_v25  ;;  %v130_v20 = vadd.f32 %v127_v26, %v112_v36 }
 0x1d0   :  { %v208_v23 = vpop.xlane.xlu0 %207 }
 0x1d1   :  { %134 = vst.msk [vmem:[#allocation3 + $0x10] sm:$0xff] %vm30_vm0, %v130_v20  ;;  %v217_v39 = vadd.f32 %v208_v23, %v165_v16 }
 0x1d2   :  { %v147_v40 = vpop.xlane.xlu1 %146  ;;  %v229_v42 = vld [vmem:[#allocation3] sm:$0xff] }
 0x1d3   :  { %220 = vst.msk [vmem:[#allocation5] sm:$0xff] %vm30_vm0, %v217_v39  ;;  %v159_v43 = vadd.f32 %v156_v38, %v147_v40  ;;  %357 = vlog2.f32 %v229_v42 }
 0x1d4   :  { %v155_v45 = vpop.xlane.xlu0 %154 }
 0x1d5   :  { %162 = vst.msk [vmem:[#allocation4] sm:$0xff] %vm30_vm0, %v159_v43  ;;  %v161_v47 = vadd.f32 %v158_v41, %v155_v45 }
 0x1d6   :  { %v151_v48 = vpop.xlane.xlu1 %150  ;;  %v230_v49 = vld [vmem:[#allocation3 + $0x8] sm:$0xff] }
 0x1d7   :  { %v160_v50 = vadd.f32 %v157_v44, %v151_v48  ;;  %164 = vst.msk [vmem:[#allocation4 + $0x10] sm:$0xff] %vm30_vm0, %v161_v47  ;;  %359 = vlog2.f32 %v230_v49  ;;  %v257_v47 = vshrl.u32 %v169_v37, 7 }
 0x1d8   :  { %v231_v52 = vld [vmem:[#allocation3 + $0x10] sm:$0xff] }
 0x1d9   :  { %163 = vst.msk [vmem:[#allocation4 + $0x8] sm:$0xff] %vm30_vm0, %v160_v50  ;;  %361 = vlog2.f32 %v231_v52  ;;  %vm308_vm10 = vcmp.eq.s32.totalorder %v257_v47, 0 }
 0x1da   :  { %v212_v53 = vpop.xlane.xlu1 %211  ;;  %v241_v9 = vld [vmem:[#allocation5] sm:$0xff] }
 0x1db   :  { %v218_v54 = vadd.f32 %v212_v53, %v166_v51 }
 0x1dc   :  { %v250_v14 = vld [vmem:[#allocation4] sm:$0xff] }
 0x1dd   :  { %v358_v56 = vpop.eup %357  ;;  %221 = vst.msk [vmem:[#allocation5 + $0x8] sm:$0xff] %vm30_vm0, %v218_v54 }
 0x1de   :  { %v216_v57 = vpop.xlane.xlu1 %215  ;;  %v233_v58 = vmul.f32 0.6931472, %v358_v56  ;;  %v252_v28 = vld [vmem:[#allocation4 + $0x10] sm:$0xff] }
 0x1df   :  { %v219_v59 = vadd.f32 %v216_v57, %v167_v55 }
 0x1e0   :  { %v238_v61 = vadd.f32 %v233_v58, %v226_v60  ;;  %v251_v27 = vld [vmem:[#allocation4 + $0x8] sm:$0xff] }
 0x1e1   :  { %v360_v62 = vpop.eup %359  ;;  %222 = vst.msk [vmem:[#allocation5 + $0x10] sm:$0xff] %vm30_vm0, %v219_v59 }
 0x1e2   :  { %v235_v63 = vmul.f32 0.6931472, %v360_v62  ;;  %v247_v0 = vmul.f32 200.0, %v238_v61  ;;  %v244_v12 = vsub.f32 %v238_v61, %v241_v9 }
 0x1e3   :  { %v362_v4 = vpop.eup %361 }
 0x1e4   :  { %v237_v10 = vmul.f32 0.6931472, %v362_v4  ;;  %v239_v11 = vadd.f32 %v235_v63, %v227_v8  ;;  %v242_v13 = vld [vmem:[#allocation5 + $0x8] sm:$0xff]  ;;  %v253_v24 = vsub.f32 %v247_v0, %v250_v14  ;;  %v274_v29 = vsel %vm30_vm0, %v244_v12, 0.0 }
 0x1e6   :  { %v240_v1 = vadd.f32 %v237_v10, %v228_v2  ;;  %v245_v17 = vsub.f32 %v239_v11, %v242_v13  ;;  %v248_v19 = vmul.f32 200.0, %v239_v11  ;;  %v288_v33 = vsel %vm30_vm0, %v253_v24, 0.0 }
 0x1e8   :  { %v243_v7 = vld [vmem:[#allocation5 + $0x10] sm:$0xff]  ;;  %v275_v6 = vsel %vm30_vm0, %v245_v17, 0.0  ;;  %v249_v5 = vmul.f32 200.0, %v240_v1  ;;  %v254_v3 = vsub.f32 %v248_v19, %v251_v27 }
 0x1e9   :  { %v246_v30 = vsub.f32 %v240_v1, %v243_v7  ;;  %v276_v31 = vadd.f32 %v275_v6, %v274_v29 }
 0x1ea   :  { %v255_v32 = vsub.f32 %v249_v5, %v252_v28  ;;  %v289_v34 = vsel %vm30_vm0, %v254_v3, 0.0 }
 0x1eb   :  { %v277_v35 = vsel %vm30_vm0, %v246_v30, 0.0  ;;  %v290_v15 = vadd.f32 %v289_v34, %v288_v33 }
 0x1ec   :  { %v278_v18 = vadd.f32 %v277_v35, %v276_v31  ;;  %v291_v22 = vsel %vm30_vm0, %v255_v32, 0.0 }
 0x1ed   :  { %v292_v21 = vadd.f32 %v291_v22, %v290_v15 }
 0x1ee   :  { %279 = vadd.xlane.f32.xlu0 %v278_v18 }
 0x1ef   :  { %293 = vadd.xlane.f32.xlu1 %v292_v21 }
 0x27b   :  { %v280_v25 = vpop.xlane.xlu0 %279 }
 0x27c   :  { %v281_v26 = vrot.slane %v280_v25, 4  ;;  %v294_v36 = vpop.xlane.xlu1 %293 }
 0x27d   :  { %v295_v16 = vrot.slane %v294_v36, 4 }
 0x27e   :  { %v282_v20 = vadd.f32 %v281_v26, %v280_v25 }
 0x27f   :  { %v296_v23 = vadd.f32 %v295_v16, %v294_v36 }
 0x280   :  { %v283_v38 = vrot.slane %v282_v20, 2 }
 0x281   :  { %v297_v39 = vrot.slane %v296_v23, 2 }
 0x282   :  { %v284_v40 = vadd.f32 %v283_v38, %v282_v20 }
 0x283   :  { %v298_v41 = vadd.f32 %v297_v39, %v296_v23 }
 0x284   :  { %v285_v42 = vrot.slane %v284_v40, 1 }
 0x285   :  { %v299_v43 = vrot.slane %v298_v41, 1 }
 0x286   :  { %v286_v44 = vadd.f32 %v285_v42, %v284_v40 }
 0x287   :  { %v300_v45 = vadd.f32 %v299_v43, %v298_v41 }
 0x288   :  { %326 = vpush %v286_v44 }
 0x289   :  { %328 = vpush %v300_v45 }
 0x2b9   :  { %s327_s1 = spop %326 }
 0x2ba   :  { %s329_s28 = spop %328  ;;  %v306_v49 = vstv %s327_s1 }
 0x2bb   :  { %v304_v48 = vstv %s329_s28 }
 0x2bc   :  { %v305_v50 = vsel %vm303_vm8, %v304_v48, 0.0 }
 0x2bd   :  { %v307_v51 = vsel %vm302_vm9, %v306_v49, %v305_v50 }
 0x2be   :  { %v309_v52 = vsel %vm308_vm10, %v307_v51, 0.0 }
 0x2bf   :  { %310 = vst [vmem:[#allocation9] sm:$0xff] %v309_v52 }
 0x2c0   :  { %396 = shalt.err (!%p393_p12)
}
 0x2c1   :  { %s397_s6 = scalar_lea.hbm %s592_s2, 128 }
 0x2c2   :  { %p398_p13 = scmp.ne.s32.totalorder %s592_s2, %s397_s6  ;;  %p401_p0 = scmp.lt.u32.totalorder %s397_s6, %s592_s2 }
 0x2c4   :  { %p403_p1 = pnand %p401_p0, %p398_p13 }
 0x2c6   :  { %406 = shalt.err (!%p403_p1)
}
 0x2c7   :  { %320 = dma.vmem_to_hbm [thread:$0]  %s318_s30, 128, %s592_s2, [#allocation8]  }
 0x2c8   :  { %409 = dma.done.wait [#allocation8], 128  }
 0x2c9   :  { %410 = vsyncadd [#allocation8], 4294967168 }
 0x2ca   :  { %324 = vsyncpa [#allocation7], 1 }
 0x2cb   :  { %325 = vsyncpa [#allocation8], 1 }

</bundles_post_ra>
